<compile_context>
chip_gen: v6e
topology: v6e:2x2x1
jax: 0.10.0
libtpu: 0.0.40
codegen_flags: <defaults>
</compile_context>

<pallas_src>
import numpy as np
import jax
import jax.numpy as jnp
from jax.experimental import pallas as pl
from jax.experimental.pallas import tpu as pltpu

NUM_LAYERS = 3
LN_EPS = 1e-5


def _uniblock_kernel(x_ref, a_ref, w1_ref, wg_ref, wla_ref, vec_ref, out_ref):
    """One grid step = one graph. All matmuls bf16 x bf16 -> f32; LN in f32.

    vec_ref rows: 0 = b1, 1..3 = bg[i], 4..6 = gamma[i], 7..9 = beta[i], 10 = bla.
    """
    H = out_ref.shape[-1]
    inv_h = 1.0 / H

    x = x_ref[0]                     # (TN, IN_PAD) bf16
    a = a_ref[0]                     # (TN, TN)     bf16, this graph's normalised adjacency

    # lin1: Linear(in_dim -> H).  Dropout (inference) -> identity.
    h = jnp.dot(x, w1_ref[...], preferred_element_type=jnp.float32) + vec_ref[0:1, :]

    js = []
    for i in range(NUM_LAYERS):
        # NaOp 'gcn': A_norm @ (h @ W) + b, then relu.
        hw = jnp.dot(h.astype(jnp.bfloat16), wg_ref[i],
                     preferred_element_type=jnp.float32)
        agg = jnp.dot(a, hw.astype(jnp.bfloat16),
                      preferred_element_type=jnp.float32) + vec_ref[1 + i:2 + i, :]
        h = jnp.maximum(agg, 0.0)
        # LayerNorm(H, affine) over the feature axis — single-pass (s1, s2 together, f32).
        s1 = jnp.sum(h, axis=-1, keepdims=True)
        s2 = jnp.sum(h * h, axis=-1, keepdims=True)
        mu = s1 * inv_h
        var = s2 * inv_h - mu * mu
        h = (h - mu) * jax.lax.rsqrt(var + LN_EPS)
        h = h * vec_ref[4 + i:5 + i, :] + vec_ref[7 + i:8 + i, :]
        # Dropout (inference) -> identity; ScOp 'skip' = identity.
        js.append(h.astype(jnp.bfloat16))

    # LaOp 'l_concat' + Linear(3H -> H): one fused K=3H matmul (Wla is [3H, H]).
    cat = jnp.concatenate(js, axis=-1)                                  # (TN, 3H) bf16
    h = jnp.dot(cat, wla_ref[...], preferred_element_type=jnp.float32) + vec_ref[10:11, :]

    # PoolOp 'global_mean': mean over this graph's nodes (graphs are contiguous, equal-size).
    # TODO(synk): ragged batches would need scalar-prefetched per-graph node counts + masked mean.
    out_ref[0] = jnp.mean(h, axis=0, keepdims=True)


def uniblock4tune_forward(xg, ag, w1, wg, wla, vec):
    G, TN, IN_PAD = xg.shape
    H = w1.shape[1]
    kH = wla.shape[0]                # 3H

    flops = G * (2 * TN * IN_PAD * H
                 + NUM_LAYERS * (2 * TN * H * H + 2 * TN * TN * H)
                 + 2 * TN * kH * H)
    bytes_accessed = (xg.size * 2 + ag.size * 2 + w1.size * 2 + wg.size * 2
                      + wla.size * 2 + vec.size * 4 + G * H * 4)

    out = pl.pallas_call(
        _uniblock_kernel,
        out_shape=jax.ShapeDtypeStruct((G, 1, H), jnp.float32),
        grid_spec=pltpu.PrefetchScalarGridSpec(
            num_scalar_prefetch=0,
            grid=(G,),                                               # one step per graph
            in_specs=[
                pl.BlockSpec((1, TN, IN_PAD), lambda g: (g, 0, 0)),  # node features of graph g
                pl.BlockSpec((1, TN, TN), lambda g: (g, 0, 0)),      # diagonal A block of graph g
                pl.BlockSpec((IN_PAD, H), lambda g: (0, 0)),         # W1 (resident)
                pl.BlockSpec((NUM_LAYERS, H, H), lambda g: (0, 0, 0)),  # Wg (resident)
                pl.BlockSpec((kH, H), lambda g: (0, 0)),             # Wla [3H, H] (resident)
                pl.BlockSpec((11, H), lambda g: (0, 0)),             # packed biases/gamma/beta
            ],
            out_specs=pl.BlockSpec((1, 1, H), lambda g: (g, 0, 0)),  # lane-dense (H=128) output
        ),
        compiler_params=pltpu.CompilerParams(
            dimension_semantics=("parallel",)),                      # megacore on v7x
        cost_estimate=pl.CostEstimate(
            flops=flops,
            transcendentals=G * NUM_LAYERS * TN,
            bytes_accessed=bytes_accessed),
    )(xg, ag, w1, wg, wla, vec)
    return out.reshape(G, H)


def reference_forward(xg, ag, params):
    """Plain-JAX reference mirroring the PyTorch forward semantics (same bf16 recipe)."""
    G = xg.shape[0]
    vec = params["vec"]
    b1, bg, gamma, beta, bla = vec[0:1], vec[1:4], vec[4:7], vec[7:10], vec[10:11]
    outs = []
    for g in range(G):
        x, a = xg[g], ag[g]
        h = jnp.dot(x, params["w1"], preferred_element_type=jnp.float32) + b1
        js = []
        for i in range(NUM_LAYERS):
            hw = jnp.dot(h.astype(jnp.bfloat16), params["wg"][i],
                         preferred_element_type=jnp.float32)
            h = jnp.maximum(jnp.dot(a, hw.astype(jnp.bfloat16),
                                    preferred_element_type=jnp.float32) + bg[i:i + 1], 0.0)
            mu = h.mean(-1, keepdims=True)
            var = ((h - mu) ** 2).mean(-1, keepdims=True)
            h = (h - mu) * jax.lax.rsqrt(var + LN_EPS)
            h = h * gamma[i:i + 1] + beta[i:i + 1]
            js.append(h.astype(jnp.bfloat16))
        cat = jnp.concatenate(js, axis=-1)
        h = jnp.dot(cat, params["wla"], preferred_element_type=jnp.float32) + bla
        outs.append(h.mean(axis=0))
    return jnp.stack(outs)


def build_graph_blocks(num_graphs, nodes_per_graph):
    """Deterministic undirected rumor-tree-like graphs (root star + chain + self-loops).
    Returns the per-graph symmetric-normalised adjacency blocks [G, TN, TN] (A is
    block-diagonal across graphs, so only the diagonal blocks are ever needed)."""
    tn = nodes_per_graph
    blocks = np.zeros((num_graphs, tn, tn), np.float32)
    for gidx in range(num_graphs):
        adj = np.zeros((tn, tn), np.float32)
        for k in range(1, tn):
            adj[0, k] = 1.0; adj[k, 0] = 1.0              # root star
            adj[k - 1, k] = 1.0; adj[k, k - 1] = 1.0      # chain
        adj += np.eye(tn, dtype=np.float32)               # self-loops
        dinv = 1.0 / np.sqrt(adj.sum(axis=1))
        blocks[gidx] = dinv[:, None] * adj * dinv[None, :]
    return jnp.asarray(blocks)


def init_params(key, in_dim, in_pad, hidden):
    ks = jax.random.split(key, 6)

    def unif(k, shape, fan_in):
        bound = 1.0 / np.sqrt(fan_in)
        return jax.random.uniform(k, shape, jnp.float32, -bound, bound)

    w1 = unif(ks[0], (in_dim, hidden), in_dim)
    w1_pad = jnp.zeros((in_pad, hidden), jnp.float32).at[:in_dim].set(w1)  # zero-pad contraction
    b1 = unif(ks[1], (1, hidden), in_dim)
    wg = unif(ks[2], (NUM_LAYERS, hidden, hidden), hidden)
    bg = unif(ks[3], (NUM_LAYERS, hidden), hidden)
    gamma = jnp.ones((NUM_LAYERS, hidden), jnp.float32)
    beta = jnp.zeros((NUM_LAYERS, hidden), jnp.float32)
    wla = unif(ks[4], (NUM_LAYERS, hidden, hidden), NUM_LAYERS * hidden)
    bla = unif(ks[5], (1, hidden), NUM_LAYERS * hidden)

    vec = jnp.concatenate([b1, bg, gamma, beta, bla], axis=0)     # (11, H) f32 packed blob
    return {
        "w1": w1_pad.astype(jnp.bfloat16),
        "wg": wg.astype(jnp.bfloat16),
        "wla": wla.reshape(NUM_LAYERS * hidden, hidden).astype(jnp.bfloat16),  # [3H, H]
        "vec": vec,
    }


if __name__ == "__main__":
    IN_DIM, IN_PAD, HIDDEN = 16, 128, 128        # H = 128 => lane-dense vregs & stores
    NUM_GRAPHS, NODES_PER_GRAPH = 4, 16          # N = 64 nodes total

    key = jax.random.PRNGKey(0)
    kx, kp = jax.random.split(key)

    x = jax.random.normal(kx, (NUM_GRAPHS, NODES_PER_GRAPH, IN_DIM), jnp.float32)   # data.x
    xg = jnp.zeros((NUM_GRAPHS, NODES_PER_GRAPH, IN_PAD), jnp.float32)
    xg = xg.at[..., :IN_DIM].set(x).astype(jnp.bfloat16)
    ag = build_graph_blocks(NUM_GRAPHS, NODES_PER_GRAPH).astype(jnp.bfloat16)       # from edge_index
    params = init_params(kp, IN_DIM, IN_PAD, HIDDEN)

    out = uniblock4tune_forward(xg, ag, params["w1"], params["wg"],
                                params["wla"], params["vec"])
    out = jax.block_until_ready(out)

    ref = reference_forward(xg, ag, params)
    assert out.shape == (NUM_GRAPHS, HIDDEN)
    assert jnp.allclose(out, ref, atol=2e-3, rtol=2e-3), "mismatch vs JAX reference"
    print("KERNEL_OK")
</pallas_src>

<mosaic_0001>
module attributes {stable_mosaic.version = 11 : i64} {
  func.func @_uniblock_kernel(%arg0: i32, %arg1: memref<1x16x128xbf16, #tpu.memory_space<vmem>>, %arg2: memref<1x16x16xbf16, #tpu.memory_space<vmem>>, %arg3: memref<128x128xbf16, #tpu.memory_space<vmem>>, %arg4: memref<3x128x128xbf16, #tpu.memory_space<vmem>>, %arg5: memref<384x128xbf16, #tpu.memory_space<vmem>>, %arg6: memref<11x128xf32, #tpu.memory_space<vmem>>, %arg7: memref<1x1x128xf32, #tpu.memory_space<vmem>>) attributes {dimension_semantics = [#tpu.dimension_semantics<parallel>], iteration_bounds = array<i64: 4>, scalar_prefetch = 0 : i64, scratch_operands = 0 : i64, tpu.core_type = #tpu.core_type<tc>, window_params = [{transform_indices = @transform_0, window_bounds = array<i64: 1, 16, 128>}, {transform_indices = @transform_1, window_bounds = array<i64: 1, 16, 16>}, {pipeline_mode = #tpu.pipeline_mode<synchronous>, transform_indices = @transform_2, window_bounds = array<i64: 128, 128>}, {pipeline_mode = #tpu.pipeline_mode<synchronous>, transform_indices = @transform_3, window_bounds = array<i64: 3, 128, 128>}, {pipeline_mode = #tpu.pipeline_mode<synchronous>, transform_indices = @transform_4, window_bounds = array<i64: 384, 128>}, {pipeline_mode = #tpu.pipeline_mode<synchronous>, transform_indices = @transform_5, window_bounds = array<i64: 11, 128>}, {transform_indices = @transform_6, window_bounds = array<i64: 1, 1, 128>}]} {
    %c0 = arith.constant 0 : index
    %c0_0 = arith.constant 0 : index
    %c0_1 = arith.constant 0 : index
    %0 = vector.load %arg1[%c0, %c0_0, %c0_1] : memref<1x16x128xbf16, #tpu.memory_space<vmem>>, vector<1x16x128xbf16>
    %1 = vector.shape_cast %0 : vector<1x16x128xbf16> to vector<16x128xbf16>
    %c0_2 = arith.constant 0 : index
    %c0_3 = arith.constant 0 : index
    %c0_4 = arith.constant 0 : index
    %2 = vector.load %arg2[%c0_2, %c0_3, %c0_4] : memref<1x16x16xbf16, #tpu.memory_space<vmem>>, vector<1x16x16xbf16>
    %3 = vector.shape_cast %2 : vector<1x16x16xbf16> to vector<16x16xbf16>
    %c0_5 = arith.constant 0 : index
    %c0_6 = arith.constant 0 : index
    %4 = vector.load %arg3[%c0_5, %c0_6] : memref<128x128xbf16, #tpu.memory_space<vmem>>, vector<128x128xbf16>
    %cst = arith.constant dense<0.000000e+00> : vector<16x128xf32>
    %5 = tpu.matmul %1, %4, %cst {dimension_numbers = #tpu.dot_dimension_numbers<[1], [0], [0], [1], [0, 0, 1, 1], [], []>} : vector<16x128xbf16>, vector<128x128xbf16>, vector<16x128xf32> -> vector<16x128xf32>
    %c0_7 = arith.constant 0 : index
    %c0_8 = arith.constant 0 : index
    %6 = vector.load %arg6[%c0_7, %c0_8] : memref<11x128xf32, #tpu.memory_space<vmem>>, vector<1x128xf32>
    %7 = vector.broadcast %6 : vector<1x128xf32> to vector<16x128xf32>
    %8 = arith.addf %5, %7 : vector<16x128xf32>
    %9 = arith.truncf %8 : vector<16x128xf32> to vector<16x128xbf16>
    %c0_9 = arith.constant 0 : index
    %c0_10 = arith.constant 0 : index
    %c0_11 = arith.constant 0 : index
    %10 = vector.load %arg4[%c0_9, %c0_10, %c0_11] : memref<3x128x128xbf16, #tpu.memory_space<vmem>>, vector<1x128x128xbf16>
    %11 = vector.shape_cast %10 : vector<1x128x128xbf16> to vector<128x128xbf16>
    %cst_12 = arith.constant dense<0.000000e+00> : vector<16x128xf32>
    %12 = tpu.matmul %9, %11, %cst_12 {dimension_numbers = #tpu.dot_dimension_numbers<[1], [0], [0], [1], [0, 0, 1, 1], [], []>} : vector<16x128xbf16>, vector<128x128xbf16>, vector<16x128xf32> -> vector<16x128xf32>
    %13 = arith.truncf %12 : vector<16x128xf32> to vector<16x128xbf16>
    %cst_13 = arith.constant dense<0.000000e+00> : vector<16x128xf32>
    %14 = tpu.matmul %3, %13, %cst_13 {dimension_numbers = #tpu.dot_dimension_numbers<[1], [0], [0], [1], [0, 0, 1, 1], [], []>} : vector<16x16xbf16>, vector<16x128xbf16>, vector<16x128xf32> -> vector<16x128xf32>
    %c1 = arith.constant 1 : index
    %c0_14 = arith.constant 0 : index
    %15 = vector.load %arg6[%c1, %c0_14] : memref<11x128xf32, #tpu.memory_space<vmem>>, vector<1x128xf32>
    %16 = vector.broadcast %15 : vector<1x128xf32> to vector<16x128xf32>
    %17 = arith.addf %14, %16 : vector<16x128xf32>
    %cst_15 = arith.constant 0.000000e+00 : f32
    %18 = vector.broadcast %cst_15 : f32 to vector<16x128xf32>
    %19 = arith.maximumf %17, %18 : vector<16x128xf32>
    %cst_16 = arith.constant dense<0.000000e+00> : vector<16xf32>
    %20 = vector.multi_reduction <add>, %19, %cst_16 [1] : vector<16x128xf32> to vector<16xf32>
    %21 = vector.shape_cast %20 : vector<16xf32> to vector<16x1xf32>
    %22 = arith.mulf %19, %19 : vector<16x128xf32>
    %cst_17 = arith.constant dense<0.000000e+00> : vector<16xf32>
    %23 = vector.multi_reduction <add>, %22, %cst_17 [1] : vector<16x128xf32> to vector<16xf32>
    %24 = vector.shape_cast %23 : vector<16xf32> to vector<16x1xf32>
    %cst_18 = arith.constant 7.812500e-03 : f32
    %25 = vector.broadcast %cst_18 : f32 to vector<16x1xf32>
    %26 = arith.mulf %21, %25 : vector<16x1xf32>
    %cst_19 = arith.constant 7.812500e-03 : f32
    %27 = vector.broadcast %cst_19 : f32 to vector<16x1xf32>
    %28 = arith.mulf %24, %27 : vector<16x1xf32>
    %29 = arith.mulf %26, %26 : vector<16x1xf32>
    %30 = arith.subf %28, %29 : vector<16x1xf32>
    %31 = vector.broadcast %26 : vector<16x1xf32> to vector<16x128xf32>
    %32 = arith.subf %19, %31 : vector<16x128xf32>
    %cst_20 = arith.constant 9.99999974E-6 : f32
    %33 = vector.broadcast %cst_20 : f32 to vector<16x1xf32>
    %34 = arith.addf %30, %33 : vector<16x1xf32>
    %35 = math.rsqrt %34 : vector<16x1xf32>
    %36 = vector.broadcast %35 : vector<16x1xf32> to vector<16x128xf32>
    %37 = arith.mulf %32, %36 : vector<16x128xf32>
    %c4 = arith.constant 4 : index
    %c0_21 = arith.constant 0 : index
    %38 = vector.load %arg6[%c4, %c0_21] : memref<11x128xf32, #tpu.memory_space<vmem>>, vector<1x128xf32>
    %39 = vector.broadcast %38 : vector<1x128xf32> to vector<16x128xf32>
    %40 = arith.mulf %37, %39 : vector<16x128xf32>
    %c7 = arith.constant 7 : index
    %c0_22 = arith.constant 0 : index
    %41 = vector.load %arg6[%c7, %c0_22] : memref<11x128xf32, #tpu.memory_space<vmem>>, vector<1x128xf32>
    %42 = vector.broadcast %41 : vector<1x128xf32> to vector<16x128xf32>
    %43 = arith.addf %40, %42 : vector<16x128xf32>
    %44 = arith.truncf %43 : vector<16x128xf32> to vector<16x128xbf16>
    %45 = arith.truncf %43 : vector<16x128xf32> to vector<16x128xbf16>
    %c1_23 = arith.constant 1 : index
    %c0_24 = arith.constant 0 : index
    %c0_25 = arith.constant 0 : index
    %46 = vector.load %arg4[%c1_23, %c0_24, %c0_25] : memref<3x128x128xbf16, #tpu.memory_space<vmem>>, vector<1x128x128xbf16>
    %47 = vector.shape_cast %46 : vector<1x128x128xbf16> to vector<128x128xbf16>
    %cst_26 = arith.constant dense<0.000000e+00> : vector<16x128xf32>
    %48 = tpu.matmul %45, %47, %cst_26 {dimension_numbers = #tpu.dot_dimension_numbers<[1], [0], [0], [1], [0, 0, 1, 1], [], []>} : vector<16x128xbf16>, vector<128x128xbf16>, vector<16x128xf32> -> vector<16x128xf32>
    %49 = arith.truncf %48 : vector<16x128xf32> to vector<16x128xbf16>
    %cst_27 = arith.constant dense<0.000000e+00> : vector<16x128xf32>
    %50 = tpu.matmul %3, %49, %cst_27 {dimension_numbers = #tpu.dot_dimension_numbers<[1], [0], [0], [1], [0, 0, 1, 1], [], []>} : vector<16x16xbf16>, vector<16x128xbf16>, vector<16x128xf32> -> vector<16x128xf32>
    %c2 = arith.constant 2 : index
    %c0_28 = arith.constant 0 : index
    %51 = vector.load %arg6[%c2, %c0_28] : memref<11x128xf32, #tpu.memory_space<vmem>>, vector<1x128xf32>
    %52 = vector.broadcast %51 : vector<1x128xf32> to vector<16x128xf32>
    %53 = arith.addf %50, %52 : vector<16x128xf32>
    %cst_29 = arith.constant 0.000000e+00 : f32
    %54 = vector.broadcast %cst_29 : f32 to vector<16x128xf32>
    %55 = arith.maximumf %53, %54 : vector<16x128xf32>
    %cst_30 = arith.constant dense<0.000000e+00> : vector<16xf32>
    %56 = vector.multi_reduction <add>, %55, %cst_30 [1] : vector<16x128xf32> to vector<16xf32>
    %57 = vector.shape_cast %56 : vector<16xf32> to vector<16x1xf32>
    %58 = arith.mulf %55, %55 : vector<16x128xf32>
    %cst_31 = arith.constant dense<0.000000e+00> : vector<16xf32>
    %59 = vector.multi_reduction <add>, %58, %cst_31 [1] : vector<16x128xf32> to vector<16xf32>
    %60 = vector.shape_cast %59 : vector<16xf32> to vector<16x1xf32>
    %cst_32 = arith.constant 7.812500e-03 : f32
    %61 = vector.broadcast %cst_32 : f32 to vector<16x1xf32>
    %62 = arith.mulf %57, %61 : vector<16x1xf32>
    %cst_33 = arith.constant 7.812500e-03 : f32
    %63 = vector.broadcast %cst_33 : f32 to vector<16x1xf32>
    %64 = arith.mulf %60, %63 : vector<16x1xf32>
    %65 = arith.mulf %62, %62 : vector<16x1xf32>
    %66 = arith.subf %64, %65 : vector<16x1xf32>
    %67 = vector.broadcast %62 : vector<16x1xf32> to vector<16x128xf32>
    %68 = arith.subf %55, %67 : vector<16x128xf32>
    %cst_34 = arith.constant 9.99999974E-6 : f32
    %69 = vector.broadcast %cst_34 : f32 to vector<16x1xf32>
    %70 = arith.addf %66, %69 : vector<16x1xf32>
    %71 = math.rsqrt %70 : vector<16x1xf32>
    %72 = vector.broadcast %71 : vector<16x1xf32> to vector<16x128xf32>
    %73 = arith.mulf %68, %72 : vector<16x128xf32>
    %c5 = arith.constant 5 : index
    %c0_35 = arith.constant 0 : index
    %74 = vector.load %arg6[%c5, %c0_35] : memref<11x128xf32, #tpu.memory_space<vmem>>, vector<1x128xf32>
    %75 = vector.broadcast %74 : vector<1x128xf32> to vector<16x128xf32>
    %76 = arith.mulf %73, %75 : vector<16x128xf32>
    %c8 = arith.constant 8 : index
    %c0_36 = arith.constant 0 : index
    %77 = vector.load %arg6[%c8, %c0_36] : memref<11x128xf32, #tpu.memory_space<vmem>>, vector<1x128xf32>
    %78 = vector.broadcast %77 : vector<1x128xf32> to vector<16x128xf32>
    %79 = arith.addf %76, %78 : vector<16x128xf32>
    %80 = arith.truncf %79 : vector<16x128xf32> to vector<16x128xbf16>
    %81 = arith.truncf %79 : vector<16x128xf32> to vector<16x128xbf16>
    %c2_37 = arith.constant 2 : index
    %c0_38 = arith.constant 0 : index
    %c0_39 = arith.constant 0 : index
    %82 = vector.load %arg4[%c2_37, %c0_38, %c0_39] : memref<3x128x128xbf16, #tpu.memory_space<vmem>>, vector<1x128x128xbf16>
    %83 = vector.shape_cast %82 : vector<1x128x128xbf16> to vector<128x128xbf16>
    %cst_40 = arith.constant dense<0.000000e+00> : vector<16x128xf32>
    %84 = tpu.matmul %81, %83, %cst_40 {dimension_numbers = #tpu.dot_dimension_numbers<[1], [0], [0], [1], [0, 0, 1, 1], [], []>} : vector<16x128xbf16>, vector<128x128xbf16>, vector<16x128xf32> -> vector<16x128xf32>
    %85 = arith.truncf %84 : vector<16x128xf32> to vector<16x128xbf16>
    %cst_41 = arith.constant dense<0.000000e+00> : vector<16x128xf32>
    %86 = tpu.matmul %3, %85, %cst_41 {dimension_numbers = #tpu.dot_dimension_numbers<[1], [0], [0], [1], [0, 0, 1, 1], [], []>} : vector<16x16xbf16>, vector<16x128xbf16>, vector<16x128xf32> -> vector<16x128xf32>
    %c3 = arith.constant 3 : index
    %c0_42 = arith.constant 0 : index
    %87 = vector.load %arg6[%c3, %c0_42] : memref<11x128xf32, #tpu.memory_space<vmem>>, vector<1x128xf32>
    %88 = vector.broadcast %87 : vector<1x128xf32> to vector<16x128xf32>
    %89 = arith.addf %86, %88 : vector<16x128xf32>
    %cst_43 = arith.constant 0.000000e+00 : f32
    %90 = vector.broadcast %cst_43 : f32 to vector<16x128xf32>
    %91 = arith.maximumf %89, %90 : vector<16x128xf32>
    %cst_44 = arith.constant dense<0.000000e+00> : vector<16xf32>
    %92 = vector.multi_reduction <add>, %91, %cst_44 [1] : vector<16x128xf32> to vector<16xf32>
    %93 = vector.shape_cast %92 : vector<16xf32> to vector<16x1xf32>
    %94 = arith.mulf %91, %91 : vector<16x128xf32>
    %cst_45 = arith.constant dense<0.000000e+00> : vector<16xf32>
    %95 = vector.multi_reduction <add>, %94, %cst_45 [1] : vector<16x128xf32> to vector<16xf32>
    %96 = vector.shape_cast %95 : vector<16xf32> to vector<16x1xf32>
    %cst_46 = arith.constant 7.812500e-03 : f32
    %97 = vector.broadcast %cst_46 : f32 to vector<16x1xf32>
    %98 = arith.mulf %93, %97 : vector<16x1xf32>
    %cst_47 = arith.constant 7.812500e-03 : f32
    %99 = vector.broadcast %cst_47 : f32 to vector<16x1xf32>
    %100 = arith.mulf %96, %99 : vector<16x1xf32>
    %101 = arith.mulf %98, %98 : vector<16x1xf32>
    %102 = arith.subf %100, %101 : vector<16x1xf32>
    %103 = vector.broadcast %98 : vector<16x1xf32> to vector<16x128xf32>
    %104 = arith.subf %91, %103 : vector<16x128xf32>
    %cst_48 = arith.constant 9.99999974E-6 : f32
    %105 = vector.broadcast %cst_48 : f32 to vector<16x1xf32>
    %106 = arith.addf %102, %105 : vector<16x1xf32>
    %107 = math.rsqrt %106 : vector<16x1xf32>
    %108 = vector.broadcast %107 : vector<16x1xf32> to vector<16x128xf32>
    %109 = arith.mulf %104, %108 : vector<16x128xf32>
    %c6 = arith.constant 6 : index
    %c0_49 = arith.constant 0 : index
    %110 = vector.load %arg6[%c6, %c0_49] : memref<11x128xf32, #tpu.memory_space<vmem>>, vector<1x128xf32>
    %111 = vector.broadcast %110 : vector<1x128xf32> to vector<16x128xf32>
    %112 = arith.mulf %109, %111 : vector<16x128xf32>
    %c9 = arith.constant 9 : index
    %c0_50 = arith.constant 0 : index
    %113 = vector.load %arg6[%c9, %c0_50] : memref<11x128xf32, #tpu.memory_space<vmem>>, vector<1x128xf32>
    %114 = vector.broadcast %113 : vector<1x128xf32> to vector<16x128xf32>
    %115 = arith.addf %112, %114 : vector<16x128xf32>
    %116 = arith.truncf %115 : vector<16x128xf32> to vector<16x128xbf16>
    %117 = tpu.concatenate %44, %80, %116 in 1 : vector<16x128xbf16>, vector<16x128xbf16>, vector<16x128xbf16> -> vector<16x384xbf16>
    %c0_51 = arith.constant 0 : index
    %c0_52 = arith.constant 0 : index
    %118 = vector.load %arg5[%c0_51, %c0_52] : memref<384x128xbf16, #tpu.memory_space<vmem>>, vector<384x128xbf16>
    %cst_53 = arith.constant dense<0.000000e+00> : vector<16x128xf32>
    %119 = tpu.matmul %117, %118, %cst_53 {dimension_numbers = #tpu.dot_dimension_numbers<[1], [0], [0], [1], [0, 0, 1, 1], [], []>} : vector<16x384xbf16>, vector<384x128xbf16>, vector<16x128xf32> -> vector<16x128xf32>
    %c10 = arith.constant 10 : index
    %c0_54 = arith.constant 0 : index
    %120 = vector.load %arg6[%c10, %c0_54] : memref<11x128xf32, #tpu.memory_space<vmem>>, vector<1x128xf32>
    %121 = vector.broadcast %120 : vector<1x128xf32> to vector<16x128xf32>
    %122 = arith.addf %119, %121 : vector<16x128xf32>
    %cst_55 = arith.constant dense<0.000000e+00> : vector<128xf32>
    %123 = vector.multi_reduction <add>, %122, %cst_55 [0] : vector<16x128xf32> to vector<128xf32>
    %124 = vector.shape_cast %123 : vector<128xf32> to vector<1x128xf32>
    %cst_56 = arith.constant 1.600000e+01 : f32
    %125 = vector.broadcast %cst_56 : f32 to vector<1x128xf32>
    %126 = arith.divf %124, %125 : vector<1x128xf32>
    %c0_57 = arith.constant 0 : index
    %c0_58 = arith.constant 0 : index
    %c0_59 = arith.constant 0 : index
    %127 = vector.load %arg7[%c0_57, %c0_58, %c0_59] : memref<1x1x128xf32, #tpu.memory_space<vmem>>, vector<1x1x128xf32>
    %128 = vector.shape_cast %127 : vector<1x1x128xf32> to vector<1x128xf32>
    %129 = vector.shape_cast %126 : vector<1x128xf32> to vector<1x1x128xf32>
    tpu.vector_store %arg7[%c0_57, %c0_58, %c0_59], %129 {strides = array<i32>} : memref<1x1x128xf32, #tpu.memory_space<vmem>>, vector<1x1x128xf32>,
    return
  }
  func.func @transform_0(%arg0: i32) -> (i32, i32, i32) {
    %c0_i32 = arith.constant 0 : i32
    %c0_i32_0 = arith.constant 0 : i32
    %c0_i32_1 = arith.constant 0 : i32
    return %arg0, %c0_i32, %c0_i32_0 : i32, i32, i32
  }
  func.func @transform_1(%arg0: i32) -> (i32, i32, i32) {
    %c0_i32 = arith.constant 0 : i32
    %c0_i32_0 = arith.constant 0 : i32
    %c0_i32_1 = arith.constant 0 : i32
    return %arg0, %c0_i32, %c0_i32_0 : i32, i32, i32
  }
  func.func @transform_2(%arg0: i32) -> (i32, i32) {
    %c0_i32 = arith.constant 0 : i32
    %c0_i32_0 = arith.constant 0 : i32
    %c0_i32_1 = arith.constant 0 : i32
    return %c0_i32, %c0_i32_0 : i32, i32
  }
  func.func @transform_3(%arg0: i32) -> (i32, i32, i32) {
    %c0_i32 = arith.constant 0 : i32
    %c0_i32_0 = arith.constant 0 : i32
    %c0_i32_1 = arith.constant 0 : i32
    %c0_i32_2 = arith.constant 0 : i32
    return %c0_i32, %c0_i32_0, %c0_i32_1 : i32, i32, i32
  }
  func.func @transform_4(%arg0: i32) -> (i32, i32) {
    %c0_i32 = arith.constant 0 : i32
    %c0_i32_0 = arith.constant 0 : i32
    %c0_i32_1 = arith.constant 0 : i32
    return %c0_i32, %c0_i32_0 : i32, i32
  }
  func.func @transform_5(%arg0: i32) -> (i32, i32) {
    %c0_i32 = arith.constant 0 : i32
    %c0_i32_0 = arith.constant 0 : i32
    %c0_i32_1 = arith.constant 0 : i32
    return %c0_i32, %c0_i32_0 : i32, i32
  }
  func.func @transform_6(%arg0: i32) -> (i32, i32, i32) {
    %c0_i32 = arith.constant 0 : i32
    %c0_i32_0 = arith.constant 0 : i32
    %c0_i32_1 = arith.constant 0 : i32
    return %arg0, %c0_i32, %c0_i32_0 : i32, i32, i32
  }
}

</mosaic_0001>

<bundles_post_ra>
// kernel: tpu_custom_call.1
= control target key start
LH: loop header
LB: loop body
LE: loop exit
PB: predicated region body
PF: predicated region fallthrough
CT: control target
= control target key end

     0   :  { %s2593_s0 = inlined_call_operand.hbm [shape: bf16[4,16,128], index: 0, kind: input, shape index: {}]   ;;  %s2594_s1 = inlined_call_operand.hbm [shape: bf16[4,16,16], index: 1, kind: input, shape index: {}]   ;;  %s2595_s2 = inlined_call_operand.hbm [shape: bf16[128,128], index: 2, kind: input, shape index: {}]   ;;  %s2596_s3 = inlined_call_operand.hbm [shape: bf16[3,128,128], index: 3, kind: input, shape index: {}]   ;;  %s2597_s4 = inlined_call_operand.hbm [shape: bf16[384,128], index: 4, kind: input, shape index: {}]   ;;  %s2598_s5 = inlined_call_operand.hbm [shape: f32[11,128], index: 5, kind: input, shape index: {}]   ;;  %s2599_s6 = inlined_call_operand.hbm [shape: f32[4,1,128], index: 6, kind: output, shape index: {}]  }
   0x1   :  { %2607 = sst [smem:[#allocation20_spill]] %s2593_s0 }
   0x2   :  { %2608 = sst [smem:[#allocation21_spill]] %s2595_s2 }
   0x3   :  { %2609 = sst [smem:[#allocation22_spill]] %s2596_s3 }
   0x4   :  { %11 = vsyncpa [#allocation3], 0 }
   0x5   :  { %13 = vsyncpa [#allocation3 + $0x1], 0 }
   0x6   :  { %14 = vsyncpa [#allocation6], 0 }
   0x7   :  { %16 = vsyncpa [#allocation6 + $0x1], 0 }
   0x8   :  { %17 = vsyncpa [#allocation9], 0 }
   0x9   :  { %18 = vsyncpa [#allocation12], 0 }
   0xa   :  { %19 = vsyncpa [#allocation4], 0 }
   0xb   :  { %21 = vsyncpa [#allocation4 + $0x1], 0  ;;  %s2260_s21 = smov 0   ;;  %s2262_s22 = smov 0  }
   0xc   :  { %s2264_s23 = smov 0   ;;  %s2266_s24 = smov 0  }
   0xd LB: > { %s2281_s25 = sadd.s32 4294967295, %s2210_s24   ;;  %s1514_s26 = sadd.s32 4294967294, %s2210_s24   ;;  %s2210_s24 = sphi %s2266_s24, %s2633_s24   ;;  %s2206_s23 = sphi %s2264_s23, %s2632_s23   ;;  %s2202_s22 = sphi %s2262_s22, %s2631_s22   ;;  %s2198_s21 = sphi %s2260_s21, %s2630_s21  }
   0xe   : > { %p47_p0 = scmp.ne.s32.totalorder %s2202_s22, %s2198_s21  ;;  %p2600_p1 = scmp.eq.s32.totalorder %s2281_s25, 0 }
   0xf   : > { %p181_p2 = scmp.eq.s32.totalorder %s2281_s25, 3  ;;  %p187_p3 = scmp.eq.s32.totalorder %s1514_s26, 3 }
  0x10   : > { %p2290_p4 = por %p2600_p1, %p47_p0  ;;  %p1515_p5 = scmp.ge.s32.totalorder %s2210_s24, 1 }
  0x11   : > { %p2295_p6 = por %p187_p3, %p47_p0  ;;  %p194_p7 = scmp.lt.s32.totalorder %s2210_s24, 5 }
  0x12   : > { %s2610_s27 = scalar_select %p2290_p4, 1, 0 }
  0x13   : > { %s2611_s28 = scalar_select %p2295_p6, 1, 0 }
  0x14   : > { %p2300_p8 = pnand %p1515_p5, %p194_p7  ;;  %s2212_s30 = smov [#allocation7]  }
  0x15   : > { %s206_s7 = sshll.u32 %s2212_s30, 4  ;;  %s2213_s9 = smov [#allocation8]   ;;  %s207_s7 = int_to_ptr.vmem [resolvable:$true] %s206_s7 }
  0x16   : > { %p1824_p9 = pneg %p2300_p8  ;;  %s219_s10 = sshll.u32 %s2213_s9, 4  ;;  %s220_s10 = int_to_ptr.vmem [resolvable:$true] %s219_s10 }
  0x17   : > { %s2214_s11 = smov [#allocation10]   ;;  %s1981_s13 = scalar_lea.vmem %s207_s7, 1024 }
  0x18   : > { %p2308_p10 = pnand %p1824_p9, %p2600_p1  ;;  %s232_s12 = sshll.u32 %s2214_s11, 4  ;;  %s233_s12 = int_to_ptr.vmem [resolvable:$true] %s232_s12 }
  0x19   : > { %p1982_p12 = scmp.ne.s32.totalorder %s207_s7, %s1981_s13  ;;  %p1989_p3 = scmp.lt.s32.totalorder %s207_s7, %s207_s7 }
  0x1a   : > { %p1972_p11 = pneg %p2308_p10  ;;  %p1990_p5 = scmp.lt.s32.totalorder %s1981_s13, %s1981_s13 }
  0x1c   : > { %p1984_p13 = pnand %p1982_p12, %p1972_p11  ;;  %p1991_p7 = por %p1990_p5, %p1989_p3 }
  0x1e   : > { %p1985_p0 = pneg %p1984_p13 }
  0x20   : > { %p1992_p9 = pnand %p1991_p7, %p1985_p0 }
  0x22   : > { %1995 = shalt.err (!%p1992_p9)
}
  0x23   : > { %s2601_s14 = smov 64   ;;  %s2603_s15 = smov 4  }
  0x24   : > { %s2614_s2 = sld [smem:[#allocation21_spill]]  ;;  %s2007_s18 = scalar_lea.vmem %s220_s10, 3072 }
  0x25   : > { %p2008_p12 = scmp.ne.s32.totalorder %s220_s10, %s2007_s18  ;;  %p2015_p0 = scmp.lt.s32.totalorder %s220_s10, %s220_s10 }
  0x26   : > { %p2016_p5 = scmp.lt.s32.totalorder %s2007_s18, %s2007_s18 }
  0x27   : > { %p2010_p13 = pnand %p2008_p12, %p1972_p11 }
  0x28   : > { %p2017_p7 = por %p2016_p5, %p2015_p0 }
  0x29   : > { %p2011_p3 = pneg %p2010_p13 }
  0x2a   : > { %1827 = dma.hbm_to_vmem [thread:$0]  (!%p2308_p10), %s2614_s2, 1024, %s207_s7, [#allocation6], %s2601_s14, %s2601_s14, %s2603_s15  }
  0x2b   : > { %p2018_p9 = pnand %p2017_p7, %p2011_p3 }
  0x2d   : > { %2021 = shalt.err (!%p2018_p9)
}
  0x2e   : > { %s2615_s3 = sld [smem:[#allocation22_spill]]  ;;  %s2033_s26 = scalar_lea.vmem %s233_s12, 3072 }
  0x2f   : > { %p2034_p1 = scmp.ne.s32.totalorder %s233_s12, %s2033_s26  ;;  %p2041_p0 = scmp.lt.s32.totalorder %s233_s12, %s233_s12 }
  0x30   : > { %p2042_p3 = scmp.lt.s32.totalorder %s2033_s26, %s2033_s26 }
  0x31   : > { %p2036_p12 = pnand %p2034_p1, %p1972_p11 }
  0x32   : > { %p2043_p5 = por %p2042_p3, %p2041_p0 }
  0x33   : > { %p2037_p13 = pneg %p2036_p12 }
  0x34   : > { %1830 = dma.hbm_to_vmem [thread:$0]  (!%p2308_p10), %s2615_s3, 3072, %s220_s10, [#allocation9], %s2601_s14, %s2601_s14, %s2603_s15  }
  0x35   : > { %p2044_p7 = pnand %p2043_p5, %p2037_p13 }
  0x37   : > { %2047 = shalt.err (!%p2044_p7)
}
  0x38   : > { %1833 = dma.hbm_to_vmem [thread:$0]  (!%p2308_p10), %s2597_s4, 3072, %s233_s12, [#allocation9], %s2601_s14, %s2601_s14, %s2603_s15  }
  0x39   : > { %s2217_s9 = smov [#allocation11]  }
  0x3a   : > { %s245_s10 = sshll.u32 %s2217_s9, 4  ;;  %s246_s10 = int_to_ptr.vmem [resolvable:$true] %s245_s10 }
  0x3b   : > { %s2059_s11 = scalar_lea.vmem %s246_s10, 256  ;;  %p2067_p13 = scmp.lt.s32.totalorder %s246_s10, %s246_s10 }
  0x3c   : > { %p2060_p1 = scmp.ne.s32.totalorder %s246_s10, %s2059_s11  ;;  %p2068_p0 = scmp.lt.s32.totalorder %s2059_s11, %s2059_s11 }
  0x3e   : > { %p2062_p9 = pnand %p2060_p1, %p1972_p11  ;;  %p2069_p3 = por %p2068_p0, %p2067_p13 }
  0x40   : > { %p2063_p12 = pneg %p2062_p9 }
  0x42   : > { %p2070_p5 = pnand %p2069_p3, %p2063_p12 }
  0x44   : > { %2073 = shalt.err (!%p2070_p5)
}
  0x45   : > { %s2218_s13 = smov 128   ;;  %s2219_s12 = smov 8  }
  0x46   : > { %1836 = dma.hbm_to_vmem [thread:$0]  (!%p2308_p10), %s2598_s5, 256, %s246_s10, [#allocation12], %s2218_s13, %s2218_s13, %s2219_s12  }
  0x47   : > { %s2356_s18 = sadd.s32 1, %s2210_s24   ;;  %s34_s20 = sadd.s32 1, %s2206_s23 }
  0x48   : > { %s31_s19 = ssub.s32 %s2210_s24, %s2356_s18  ;;  %p41_p7 = scmp.ne.s32.totalorder %s2206_s23, %s2202_s22 }
  0x49   : > { %p32_p11 = scmp.eq.s32.totalorder %s31_s19, 0  ;;  %p42_p1 = scmp.eq.s32.totalorder %s2210_s24, 0 }
  0x4a   : > { %p2369_p12 = por %p181_p2, %p41_p7  ;;  %p1852_p13 = scmp.lt.s32.totalorder %s2210_s24, 4 }
  0x4b   : > { %s2365_s26 = scalar_select %p32_p11, %s2206_s23, %s34_s20  }
  0x4c   : > { %p43_p9 = por %p42_p1, %p41_p7  ;;  %s259_s8 = sand.u32 1, %s2206_s23  }
  0x4d   : > { %s2616_s30 = scalar_select %p2369_p12, 1, 0 }
  0x4e   : > { %s1521_s7 = sshll.u32 %s259_s8, 3  ;;  %s1609_s9 = sshll.u32 %s2210_s24, 7 }
  0x4f   : > { %s2617_s0 = sld [smem:[#allocation20_spill]]  ;;  %s263_s12 = scalar_lea.vmem [#allocation2], %s1521_s7 }
  0x50   : > { %s270_s16 = sshll.u32 %s263_s12, 4  ;;  %p2383_p2 = pnand %p1852_p13, %p43_p9  ;;  %s2381_s16 = int_to_ptr.vmem [resolvable:$true] %s270_s16 }
  0x51   : > { %s2390_s14 = scalar_lea.hbm %s2594_s1, %s1609_s9  ;;  %s284_s10 = scalar_lea.vmem [#allocation5], %s1521_s7 }
  0x52   : > { %s2392_s11 = sshll.u32 %s284_s10, 4  ;;  %s2394_s15 = scalar_lea.sflag [#allocation3], %s259_s8  ;;  %s2425_s11 = int_to_ptr.vmem [resolvable:$true] %s2392_s11 }
  0x53   : > { %p2076_p0 = pneg %p2383_p2 }
  0x55   : > { %s2379_s13 = scalar_lea.hbm %s2617_s0, %s1609_s9  ;;  %s2079_s19 = scalar_lea.hbm %s2617_s0, 512 }
  0x56   : > { %s2074_s2 = scalar_lea.hbm %s2379_s13, 128  ;;  %p2080_p11 = scmp.lt.s32.totalorder %s2379_s13, %s2617_s0 }
  0x57   : > { %p2075_p10 = scmp.ne.s32.totalorder %s2379_s13, %s2074_s2  ;;  %p2081_p7 = scmp.lt.s32.totalorder %s2079_s19, %s2074_s2 }
  0x59   : > { %p2077_p3 = pnand %p2076_p0, %p2075_p10  ;;  %p2082_p1 = por %p2081_p7, %p2080_p11 }
  0x5b   : > { %p2078_p5 = pneg %p2077_p3 }
  0x5d   : > { %p2083_p9 = pnand %p2082_p1, %p2078_p5 }
  0x5f   : > { %2086 = shalt.err (!%p2083_p9)
}
  0x60   : > { %s2087_s8 = scalar_lea.vmem %s2381_s16, 128  ;;  %s2220_s3 = smov [#allocation2]  }
  0x61   : > { %p2088_p13 = scmp.ne.s32.totalorder %s2381_s16, %s2087_s8  ;;  %s2092_s7 = sshll.u32 %s2220_s3, 4  ;;  %s2093_s7 = int_to_ptr.vmem [resolvable:$false] %s2092_s7 }
  0x62   : > { %s2094_s10 = scalar_lea.vmem %s2093_s7, 256  ;;  %p2095_p6 = scmp.lt.s32.totalorder %s2381_s16, %s2093_s7 }
  0x63   : > { %p2090_p10 = pnand %p2088_p13, %p2076_p0  ;;  %p2096_p12 = scmp.lt.s32.totalorder %s2094_s10, %s2087_s8 }
  0x65   : > { %p2091_p3 = pneg %p2090_p10  ;;  %p2097_p4 = por %p2096_p12, %p2095_p6 }
  0x67   : > { %p2098_p11 = pnand %p2097_p4, %p2091_p3 }
  0x69   : > { %2101 = shalt.err (!%p2098_p11)
}
  0x6a   : > { %s2619_s2 = smov 4   ;;  %s2620_s12 = smov 64  }
  0x6b   : > { %1840 = dma.hbm_to_vmem [thread:$0]  (!%p2383_p2), %s2379_s13, 128, %s2381_s16, %s2394_s15, %s2620_s12, %s2620_s12, %s2619_s2  }
  0x6c   : > { %s280_s19 = sand.u32 1, %s2210_s24   ;;  %s2102_s9 = scalar_lea.hbm %s2390_s14, 128 }
  0x6d   : > { %s281_s20 = scalar_lea.sflag [#allocation6], %s280_s19  ;;  %p2103_p4 = scmp.ne.s32.totalorder %s2390_s14, %s2102_s9 }
  0x6e   : > { %s2107_s7 = scalar_lea.hbm %s2594_s1, 512  ;;  %p2108_p5 = scmp.lt.s32.totalorder %s2390_s14, %s2594_s1 }
  0x6f   : > { %p2105_p6 = pnand %p2103_p4, %p2076_p0  ;;  %p2109_p7 = scmp.lt.s32.totalorder %s2107_s7, %s2102_s9 }
  0x71   : > { %p2106_p12 = pneg %p2105_p6  ;;  %p2110_p1 = por %p2109_p7, %p2108_p5 }
  0x73   : > { %p2111_p9 = pnand %p2110_p1, %p2106_p12 }
  0x75   : > { %2114 = shalt.err (!%p2111_p9)
}
  0x76   : > { %s2115_s15 = scalar_lea.vmem %s2425_s11, 128  ;;  %s2221_s13 = smov [#allocation5]  }
  0x77   : > { %p2116_p13 = scmp.ne.s32.totalorder %s2425_s11, %s2115_s15  ;;  %s2120_s16 = sshll.u32 %s2221_s13, 4  ;;  %s2121_s16 = int_to_ptr.vmem [resolvable:$false] %s2120_s16 }
  0x78   : > { %s2122_s19 = scalar_lea.vmem %s2121_s16, 256  ;;  %p2123_p11 = scmp.lt.s32.totalorder %s2425_s11, %s2121_s16 }
  0x79   : > { %p2118_p10 = pnand %p2116_p13, %p2076_p0  ;;  %p2124_p4 = scmp.lt.s32.totalorder %s2122_s19, %s2115_s15 }
  0x7b   : > { %p2119_p3 = pneg %p2118_p10  ;;  %p2125_p6 = por %p2124_p4, %p2123_p11 }
  0x7d   : > { %p2126_p5 = pnand %p2125_p6, %p2119_p3 }
  0x7f   : > { %2129 = shalt.err (!%p2126_p5)
}
  0x80   : > { %1843 = dma.hbm_to_vmem [thread:$0]  (!%p2383_p2), %s2390_s14, 128, %s2425_s11, %s281_s20, %s2620_s12, %s2620_s12, %s2619_s2  }
  0x81   : > { %303 = sbr.rel (%p2300_p8) target bundleno = 2328 (0x918), region = 44  ;;  %s2456_s0 = sand.u32 (!%p2300_p8), 1, %s2202_s22  }
  0x82   : > { %s1528_s9 = sshll.u32 (!%p2300_p8), %s2456_s0, 3  ;;  %s306_s8 = scalar_lea.sflag (!%p2300_p8), [#allocation3], %s2456_s0 }
  0x83   : > { %s2460_s3 = scalar_lea.vmem (!%p2300_p8), [#allocation2], %s1528_s9  ;;  %p2621_p0 = scmp.ne.s32.totalorder (!%p2300_p8), %s2610_s27, 0 }
  0x86   : > { %2173 = dma.done.wait (%p2621_p0), %s306_s8, 128  }
  0x87   : > { %2175 = vsyncadd (%p2621_p0), %s306_s8, 4294967168  ;;  %s314_s14 = sand.u32 1, %s2281_s25   ;;  %s2467_s17 = scalar_lea.vmem [#allocation5], %s1528_s9 }
  0x88   : > { %s315_s29 = scalar_lea.sflag [#allocation6], %s314_s14 }
  0x89   : > { %2177 = dma.done.wait (%p2621_p0), %s315_s29, 128  }
  0x8a   : > { %2179 = vsyncadd (%p2621_p0), %s315_s29, 4294967168  ;;  %p2622_p8 = scmp.eq.s32.totalorder %s2281_s25, 0 }
  0x8c   : > { %2181 = dma.done.wait (%p2622_p8), [#allocation6], 1024   ;;  %p2623_p2 = pmov %p2622_p8 }
  0x8e   : > { %2183 = vsyncadd (%p2623_p2), [#allocation6], 4294966272  ;;  %p2624_p12 = pmov %p2623_p2 }
  0x8f   : > { %p2625_p7 = pmov %p2623_p2 }
  0x90   : > { %2185 = dma.done.wait (%p2624_p12), [#allocation9], 6144  }
  0x91   : > { %2187 = vsyncadd (%p2625_p7), [#allocation9], 4294961152  ;;  %p2626_p1 = pmov %p2623_p2 }
  0x93   : > { %2189 = dma.done.wait (%p2626_p1), [#allocation12], 256   ;;  %p2627_p9 = pmov %p2626_p1 }
  0x94   : > { %v2222_v0 = vmov 0.0   ;;  %vm2223_vm0 = vmmov 0   ;;  %v1900_v1 = vld [vmem:[#allocation7 + $0x38] sm:$0xff]   ;;  %v1901_v2 = vld [vmem:[#allocation7 + $0x30] sm:$0xff]   ;;  %v1902_v3 = vld [vmem:[#allocation7 + $0x28] sm:$0xff]   ;;  %vm605_vm1 = vcmask 130048  }
  0x95   : > { %2191 = vsyncadd (%p2627_p9), [#allocation12], 4294967040  ;;  %1684 = vmatprep.subr.bf16.mxu0 %v2222_v0  ;;  %1700 = vmatprep.mubr.msk.bf16.mxu0 %vm2223_vm0, %v2222_v0  ;;  %v1909_v4 = vld [vmem:[#allocation8 + $0x38] sm:$0xff]   ;;  %v1903_v5 = vld [vmem:[#allocation7 + $0x20] sm:$0xff]   ;;  %s1606_s27 = sshll.u32 %s2281_s25, 4  ;;  %s366_s11 = scalar_lea.vmem [#allocation13], %s2456_s0 }
  0x96   : > { %1704 = vmatprep.subr.bf16.mxu1 %v2222_v0  ;;  %1720 = vmatprep.mubr.msk.bf16.mxu1 %vm2223_vm0, %v2222_v0  ;;  %v1910_v6 = vld [vmem:[#allocation8 + $0x30] sm:$0xff]   ;;  %v1904_v7 = vld [vmem:[#allocation7 + $0x18] sm:$0xff]   ;;  %v1911_v8 = vld [vmem:[#allocation8 + $0x28] sm:$0xff]   ;;  %s1387_s2 = sshll.u32 %s366_s11, 4  ;;  %s1385_s7 = scalar_lea.hbm %s2599_s6, %s1606_s27  ;;  %s1388_s2 = int_to_ptr.vmem [resolvable:$true] %s1387_s2 }
  0x97   : > { %1685 = vmatpush3.bf16.msra.mxu0 %v1900_v1  ;;  %1705 = vmatpush3.bf16.msra.mxu1 %v1909_v4  ;;  %v1905_v9 = vld [vmem:[#allocation7 + $0x10] sm:$0xff]   ;;  %v1912_v10 = vld [vmem:[#allocation8 + $0x20] sm:$0xff]   ;;  %v1906_v11 = vld [vmem:[#allocation7 + $0x8] sm:$0xff]   ;;  %s1375_s10 = scalar_lea.sflag [#allocation4], %s2456_s0  ;;  %s2130_s15 = scalar_lea.vmem %s1388_s2, 16 }
  0x98   : > { %1686 = vmatprep.subr.bf16.mxu0 %v2222_v0  ;;  %1706 = vmatprep.subr.bf16.mxu1 %v2222_v0  ;;  %v1913_v12 = vld [vmem:[#allocation8 + $0x18] sm:$0xff]   ;;  %v1907_v13 = vld [vmem:[#allocation7] sm:$0xff]   ;;  %v1914_v14 = vld [vmem:[#allocation8 + $0x10] sm:$0xff]   ;;  %p2131_p13 = scmp.ne.s32.totalorder %s1388_s2, %s2130_s15  ;;  %p2628_p10 = scmp.ne.s32.totalorder %s2616_s30, 0 }
  0x99   : > { %v1908_v15 = vld [vmem:[%s2460_s3] sm:$0xff]   ;;  %v2513_v31 = vld [vmem:[%s2467_s17] sm:$0xff]   ;;  %s2224_s13 = smov [#allocation13]  }
  0x9a   : > { %v1915_v16 = vld [vmem:[#allocation8 + $0x8] sm:$0xff]   ;;  %v1916_v17 = vld [vmem:[#allocation8] sm:$0xff]   ;;  %v1918_v43 = vld [vmem:[#allocation8 + $0x78] sm:$0xff]   ;;  %p2132_p3 = pnand %p2131_p13, %p2628_p10  ;;  %s2134_s16 = sshll.u32 %s2224_s13, 4  ;;  %s2135_s16 = int_to_ptr.vmem [resolvable:$false] %s2134_s16 }
  0x9b   : > { %1687 = vmatpush3.bf16.msra.mxu0 %v1901_v2  ;;  %1707 = vmatpush3.bf16.msra.mxu1 %v1910_v6  ;;  %v1534_v19 = vld [vmem:[#allocation11] ss:$0 sm:$0xff]  ;;  %v1552_v32 = vld [vmem:[#allocation11 + $0x1] ss:$0 sm:$0xff]  ;;  %v1919_v44 = vld [vmem:[#allocation8 + $0x70] sm:$0xff]   ;;  %s2136_s25 = scalar_lea.vmem %s2135_s16, 32  ;;  %p2137_p4 = scmp.lt.s32.totalorder %s1388_s2, %s2135_s16 }
  0x9c   : > { %1688 = vmatprep.subr.bf16.mxu0 %v2222_v0  ;;  %1708 = vmatprep.subr.bf16.mxu1 %v2222_v0  ;;  %v1920_v45 = vld [vmem:[#allocation8 + $0x68] sm:$0xff]   ;;  %v1921_v46 = vld [vmem:[#allocation8 + $0x60] sm:$0xff]   ;;  %v1922_v47 = vld [vmem:[#allocation8 + $0x58] sm:$0xff]   ;;  %p2133_p11 = pneg %p2132_p3  ;;  %p2138_p6 = scmp.lt.s32.totalorder %s2136_s25, %s2130_s15 }
  0x9d   : > { %v1923_v48 = vld [vmem:[#allocation8 + $0x50] sm:$0xff]   ;;  %v1924_v49 = vld [vmem:[#allocation8 + $0x48] sm:$0xff]   ;;  %v1925_v50 = vld [vmem:[#allocation8 + $0x40] sm:$0xff]  }
  0x9e   : > { %p2139_p5 = por %p2138_p6, %p2137_p4 }
  0x9f   : > { %1689 = vmatpush3.bf16.msra.mxu0 %v1902_v3  ;;  %1709 = vmatpush3.bf16.msra.mxu1 %v1911_v8 }
  0xa0   : > { %1690 = vmatprep.subr.bf16.mxu0 %v2222_v0  ;;  %1710 = vmatprep.subr.bf16.mxu1 %v2222_v0  ;;  %p2140_p0 = pnand %p2139_p5, %p2133_p11 }
  0xa3   : > { %1691 = vmatpush3.bf16.msra.mxu0 %v1903_v5  ;;  %1711 = vmatpush3.bf16.msra.mxu1 %v1912_v10  ;;  %v1555_v5 = vld [vmem:[#allocation11 + $0x4] ss:$0 sm:$0xff]  ;;  %v1556_v10 = vld [vmem:[#allocation11 + $0x7] ss:$0 sm:$0xff] }
  0xa4   : > { %1692 = vmatprep.subr.bf16.mxu0 %v2222_v0  ;;  %1712 = vmatprep.subr.bf16.mxu1 %v2222_v0 }
  0xa7   : > { %1693 = vmatpush3.bf16.msra.mxu0 %v1904_v7  ;;  %1713 = vmatpush3.bf16.msra.mxu1 %v1913_v12 }
  0xa8   : > { %1694 = vmatprep.subr.bf16.mxu0 %v2222_v0  ;;  %1714 = vmatprep.subr.bf16.mxu1 %v2222_v0 }
  0xab   : > { %1695 = vmatpush3.bf16.msra.mxu0 %v1905_v9  ;;  %1715 = vmatpush3.bf16.msra.mxu1 %v1914_v14 }
  0xac   : > { %1696 = vmatprep.subr.bf16.mxu0 %v2222_v0  ;;  %1716 = vmatprep.subr.bf16.mxu1 %v2222_v0 }
  0xaf   : > { %1697 = vmatpush3.bf16.msra.mxu0 %v1906_v11  ;;  %1717 = vmatpush3.bf16.msra.mxu1 %v1915_v16 }
  0xb0   : > { %1698 = vmatprep.subr.bf16.mxu0 %v2222_v0  ;;  %1718 = vmatprep.subr.bf16.mxu1 %v2222_v0 }
  0xb3   : > { %1699 = vmatpush3.bf16.msra.mxu0 %v1907_v13  ;;  %1719 = vmatpush3.bf16.msra.mxu1 %v1916_v17 }
  0xb4   : > { %1724 = vmatprep.subr.bf16.mxu0 %v2222_v0  ;;  %1730 = vmatprep.subr.bf16.mxu1 %v2222_v0 }
  0xb6   : > { %1701 = vmatmul.mubr.bf16.vlgmr.msra.gmra.mxu0 %v1908_v15 }
  0xb7   : > { %1726 = vmatprep.mubr.msk.bf16.mxu0 %vm2223_vm0, %v2222_v0 }
 0x176   : > { %v481_v18 = vpop.f32.mrf.mxu0 }
 0x177   : > { %v482_v22 = vadd.f32 %v1534_v19, %v481_v18 }
 0x178   : > { %v1702_v20 = vpop.f32.mrf.mxu0 }
 0x179   : > { %v1565_v20 = vld [vmem:[#allocation11 + $0x2] ss:$0 sm:$0xff] }
 0x17a   : > { %v484_v21 = vpop.f32.mrf.mxu0 }
 0x17b   : > { %v485_v23 = vadd.f32 %v1534_v19, %v484_v21 }
 0x17c   : > { %v1703_v24 = vpop.f32.mrf.mxu0 }
 0x17d   : > { %v488_v25 = vpack.c.bf16 %v485_v23, %v482_v22 }
 0x17f   : > { %1721 = vmatmul.mubr.bf16.vlgmr.msra.gmra.mxu1 %v488_v25 }
 0x180   : > { %1746 = vmatprep.mubr.msk.bf16.mxu1 %vm2223_vm0, %v2222_v0  ;;  %1731 = vmatpush3.bf16.msra.mxu1 %v1918_v43 }
 0x181   : > { %1732 = vmatprep.subr.bf16.mxu1 %v2222_v0 }
 0x184   : > { %1733 = vmatpush3.bf16.msra.mxu1 %v1919_v44 }
 0x185   : > { %1734 = vmatprep.subr.bf16.mxu1 %v2222_v0 }
 0x188   : > { %1735 = vmatpush3.bf16.msra.mxu1 %v1920_v45 }
 0x189   : > { %1736 = vmatprep.subr.bf16.mxu1 %v2222_v0 }
 0x18c   : > { %1737 = vmatpush3.bf16.msra.mxu1 %v1921_v46 }
 0x18d   : > { %1738 = vmatprep.subr.bf16.mxu1 %v2222_v0 }
 0x190   : > { %1739 = vmatpush3.bf16.msra.mxu1 %v1922_v47 }
 0x191   : > { %1740 = vmatprep.subr.bf16.mxu1 %v2222_v0 }
 0x194   : > { %1741 = vmatpush3.bf16.msra.mxu1 %v1923_v48 }
 0x195   : > { %1742 = vmatprep.subr.bf16.mxu1 %v2222_v0 }
 0x198   : > { %1743 = vmatpush3.bf16.msra.mxu1 %v1924_v49 }
 0x199   : > { %1744 = vmatprep.subr.bf16.mxu1 %v2222_v0 }
 0x19c   : > { %1745 = vmatpush3.bf16.msra.mxu1 %v1925_v50 }
 0x19d   : > { %1776 = vmatprep.subr.bf16.mxu1 %v2222_v0 }
 0x23f   : > { %v587_v26 = vpop.f32.mrf.mxu1 }
 0x241   : > { %v1722_v27 = vpop.f32.mrf.mxu1 }
 0x243   : > { %v590_v28 = vpop.f32.mrf.mxu1 }
 0x244   : > { %v594_v29 = vpack.c.bf16 %v590_v28, %v587_v26 }
 0x245   : > { %v1723_v30 = vpop.f32.mrf.mxu1 }
 0x246   : > { %1725 = vmatpush3.bf16.msra.mxu0 %v594_v29 }
 0x247   : > { %1750 = vmatprep.subr.bf16.mxu0 %v2222_v0 }
 0x249   : > { %1727 = vmatmul.mubr.msk.bf16.vlgmr.msra.gmra.mxu0 %vm605_vm1, %v2513_v31 }
 0x24a   : > { %1752 = vmatprep.mubr.msk.bf16.mxu0 %vm2223_vm0, %v2222_v0 }
 0x309   : > { %v643_v33 = vpop.f32.mrf.mxu0 }
 0x30a   : > { %v644_v34 = vadd.f32 %v1552_v32, %v643_v33  ;;  %v1927_v33 = vld [vmem:[#allocation8 + $0xb0] sm:$0xff]  }
 0x30b   : > { %v1728_v35 = vpop.f32.mrf.mxu0 }
 0x30c   : > { %v650_v36 = vmax.f32 %v644_v34, 0.0  ;;  %v1928_v34 = vld [vmem:[#allocation8 + $0xa8] sm:$0xff]   ;;  %v1929_v35 = vld [vmem:[#allocation8 + $0xa0] sm:$0xff]  }
 0x30d   : > { %v646_v37 = vpop.f32.mrf.mxu0 }
 0x30e   : > { %v647_v38 = vadd.f32 %v1552_v32, %v646_v37  ;;  %652 = vadd.xlane.f32.xlu0 %v650_v36  ;;  %v656_v39 = vmul.f32 %v650_v36, %v650_v36  ;;  %v1926_v32 = vld [vmem:[#allocation8 + $0xb8] sm:$0xff]   ;;  %v1931_v37 = vld [vmem:[#allocation8 + $0x90] sm:$0xff]  }
 0x30f   : > { %v1729_v40 = vpop.f32.mrf.mxu0 }
 0x310   : > { %v651_v41 = vmax.f32 %v647_v38, 0.0  ;;  %658 = vadd.xlane.f32.xlu1 %v656_v39  ;;  %v1932_v38 = vld [vmem:[#allocation8 + $0x88] sm:$0xff]   ;;  %v1933_v39 = vld [vmem:[#allocation8 + $0x80] sm:$0xff]  }
 0x312   : > { %654 = vadd.xlane.f32.xlu0 %v651_v41  ;;  %v657_v42 = vmul.f32 %v651_v41, %v651_v41 }
 0x314   : > { %660 = vadd.xlane.f32.xlu1 %v657_v42 }
 0x397   : > { %v653_v51 = vpop.xlane.xlu0 %652 }
 0x398   : > { %v662_v52 = vmul.f32 0.0078125, %v653_v51 }
 0x399   : > { %v659_v53 = vpop.xlane.xlu1 %658 }
 0x39a   : > { %v666_v54 = vmul.f32 %v662_v52, %v662_v52  ;;  %v664_v55 = vmul.f32 0.0078125, %v659_v53  ;;  %v670_v2 = vsub.f32 %v650_v36, %v662_v52  ;;  %v1930_v36 = vld [vmem:[#allocation8 + $0x98] sm:$0xff]  }
 0x39b   : > { %v655_v56 = vpop.xlane.xlu0 %654 }
 0x39c   : > { %v668_v57 = vsub.f32 %v664_v55, %v666_v54  ;;  %v663_v58 = vmul.f32 0.0078125, %v655_v56 }
 0x39d   : > { %v661_v59 = vpop.xlane.xlu1 %660 }
 0x39e   : > { %v672_v60 = vadd.f32 1e-05, %v668_v57  ;;  %v667_v61 = vmul.f32 %v663_v58, %v663_v58  ;;  %v665_v62 = vmul.f32 0.0078125, %v661_v59  ;;  %v671_v6 = vsub.f32 %v651_v41, %v663_v58  ;;  %v1567_v57 = vld [vmem:[#allocation11 + $0x5] ss:$0 sm:$0xff] }
 0x3a0   : > { %1958 = vrsqrt.f32 %v672_v60  ;;  %v669_v63 = vsub.f32 %v665_v62, %v667_v61  ;;  %v1568_v62 = vld [vmem:[#allocation11 + $0x8] ss:$0 sm:$0xff] }
 0x3a2   : > { %v673_v1 = vadd.f32 1e-05, %v669_v63 }
 0x3a4   : > { %1960 = vrsqrt.f32 %v673_v1 }
 0x3ad   : > { %v1959_v3 = vpop.eup %1958 }
 0x3ae   : > { %v676_v4 = vmul.f32 %v1959_v3, %v670_v2 }
 0x3b0   : > { %v683_v9 = vmul.f32 %v1555_v5, %v676_v4 }
 0x3b1   : > { %v1961_v7 = vpop.eup %1960 }
 0x3b2   : > { %v677_v8 = vmul.f32 %v1961_v7, %v671_v6  ;;  %v690_v12 = vadd.f32 %v1556_v10, %v683_v9  ;;  %v1934_v7 = vld [vmem:[#allocation10 + $0x78] sm:$0xff]  }
 0x3b4   : > { %v684_v11 = vmul.f32 %v1555_v5, %v677_v8 }
 0x3b6   : > { %v691_v13 = vadd.f32 %v1556_v10, %v684_v11  ;;  %v1935_v10 = vld [vmem:[#allocation10 + $0x38] sm:$0xff]   ;;  %v1936_v11 = vld [vmem:[#allocation10 + $0x70] sm:$0xff]  }
 0x3b8   : > { %v2528_v14 = vpack.c.bf16 %v691_v13, %v690_v12  ;;  %v1937_v12 = vld [vmem:[#allocation10 + $0x30] sm:$0xff]   ;;  %v1938_v13 = vld [vmem:[#allocation10 + $0x68] sm:$0xff]  }
 0x3ba   : > { %1747 = vmatmul.mubr.bf16.vlgmr.msra.gmra.mxu1 %v2528_v14 }
 0x3bb   : > { %1778 = vmatprep.mubr.msk.bf16.mxu1 %vm2223_vm0, %v2222_v0 }
 0x47a   : > { %v792_v15 = vpop.f32.mrf.mxu1 }
 0x47c   : > { %v1748_v16 = vpop.f32.mrf.mxu1 }
 0x47d   : > { %v1940_v16 = vld [vmem:[#allocation10 + $0x60] sm:$0xff]  }
 0x47e   : > { %v795_v17 = vpop.f32.mrf.mxu1 }
 0x47f   : > { %v799_v18 = vpack.c.bf16 %v795_v17, %v792_v15  ;;  %v1939_v15 = vld [vmem:[#allocation10 + $0x28] sm:$0xff]   ;;  %v1941_v17 = vld [vmem:[#allocation10 + $0x20] sm:$0xff]  }
 0x480   : > { %v1749_v19 = vpop.f32.mrf.mxu1 }
 0x481   : > { %1751 = vmatpush3.bf16.msra.mxu0 %v799_v18  ;;  %v1942_v18 = vld [vmem:[#allocation10 + $0x58] sm:$0xff]  }
 0x482   : > { %1756 = vmatprep.subr.bf16.mxu0 %v2222_v0  ;;  %v1943_v19 = vld [vmem:[#allocation10 + $0x18] sm:$0xff]  }
 0x484   : > { %1753 = vmatmul.mubr.msk.bf16.vlgmr.msra.gmra.mxu0 %vm605_vm1, %v2513_v31 }
 0x485   : > { %1772 = vmatprep.mubr.msk.bf16.mxu0 %vm2223_vm0, %v2222_v0  ;;  %1757 = vmatpush3.bf16.msra.mxu0 %v1926_v32 }
 0x486   : > { %1758 = vmatprep.subr.bf16.mxu0 %v2222_v0 }
 0x489   : > { %1759 = vmatpush3.bf16.msra.mxu0 %v1927_v33 }
 0x48a   : > { %1760 = vmatprep.subr.bf16.mxu0 %v2222_v0 }
 0x48d   : > { %1761 = vmatpush3.bf16.msra.mxu0 %v1928_v34 }
 0x48e   : > { %1762 = vmatprep.subr.bf16.mxu0 %v2222_v0 }
 0x491   : > { %1763 = vmatpush3.bf16.msra.mxu0 %v1929_v35 }
 0x492   : > { %1764 = vmatprep.subr.bf16.mxu0 %v2222_v0 }
 0x495   : > { %1765 = vmatpush3.bf16.msra.mxu0 %v1930_v36 }
 0x496   : > { %1766 = vmatprep.subr.bf16.mxu0 %v2222_v0 }
 0x499   : > { %1767 = vmatpush3.bf16.msra.mxu0 %v1931_v37  ;;  %v1950_v37 = vld [vmem:[#allocation10 + $0xb8] sm:$0xff]  }
 0x49a   : > { %1768 = vmatprep.subr.bf16.mxu0 %v2222_v0 }
 0x49d   : > { %1769 = vmatpush3.bf16.msra.mxu0 %v1932_v38  ;;  %v1952_v38 = vld [vmem:[#allocation10 + $0xa8] sm:$0xff]  }
 0x49e   : > { %1770 = vmatprep.subr.bf16.mxu0 %v2222_v0 }
 0x4a1   : > { %1771 = vmatpush3.bf16.msra.mxu0 %v1933_v39  ;;  %v1953_v39 = vld [vmem:[#allocation10 + $0xa0] sm:$0xff]  }
 0x4a2   : > { %1782 = vmatprep.subr.bf16.mxu0 %v2222_v0 }
 0x544   : > { %v839_v21 = vpop.f32.mrf.mxu0 }
 0x545   : > { %v840_v22 = vadd.f32 %v1565_v20, %v839_v21  ;;  %v1945_v21 = vld [vmem:[#allocation10 + $0x10] sm:$0xff]  }
 0x546   : > { %v1754_v23 = vpop.f32.mrf.mxu0 }
 0x547   : > { %v846_v24 = vmax.f32 %v840_v22, 0.0  ;;  %v1947_v22 = vld [vmem:[#allocation10 + $0x8] sm:$0xff]   ;;  %v1948_v23 = vld [vmem:[#allocation10 + $0x40] sm:$0xff]  }
 0x548   : > { %v842_v25 = vpop.f32.mrf.mxu0 }
 0x549   : > { %v843_v26 = vadd.f32 %v1565_v20, %v842_v25  ;;  %848 = vadd.xlane.f32.xlu0 %v846_v24  ;;  %v852_v29 = vmul.f32 %v846_v24, %v846_v24  ;;  %v1944_v20 = vld [vmem:[#allocation10 + $0x50] sm:$0xff]   ;;  %v1577_v25 = vld [vmem:[#allocation11 + $0x3] ss:$0 sm:$0xff] }
 0x54a   : > { %v1755_v27 = vpop.f32.mrf.mxu0 }
 0x54b   : > { %v847_v28 = vmax.f32 %v843_v26, 0.0 }
 0x54d   : > { %854 = vadd.xlane.f32.xlu0 %v852_v29  ;;  %850 = vadd.xlane.f32.xlu1 %v847_v28  ;;  %v853_v30 = vmul.f32 %v847_v28, %v847_v28 }
 0x551   : > { %856 = vadd.xlane.f32.xlu1 %v853_v30 }
 0x5d2   : > { %v849_v40 = vpop.xlane.xlu0 %848 }
 0x5d3   : > { %v858_v41 = vmul.f32 0.0078125, %v849_v40  ;;  %v1954_v40 = vld [vmem:[#allocation10 + $0x98] sm:$0xff]  }
 0x5d5   : > { %v862_v44 = vmul.f32 %v858_v41, %v858_v41  ;;  %v866_v54 = vsub.f32 %v846_v24, %v858_v41  ;;  %v1949_v24 = vld [vmem:[#allocation10] sm:$0xff]   ;;  %v1955_v41 = vld [vmem:[#allocation10 + $0x90] sm:$0xff]  }
 0x5d6   : > { %v855_v42 = vpop.xlane.xlu0 %854  ;;  %v851_v43 = vpop.xlane.xlu1 %850 }
 0x5d7   : > { %v860_v45 = vmul.f32 0.0078125, %v855_v42  ;;  %v859_v46 = vmul.f32 0.0078125, %v851_v43  ;;  %v1956_v42 = vld [vmem:[#allocation10 + $0x88] sm:$0xff]   ;;  %v1957_v43 = vld [vmem:[#allocation10 + $0x80] sm:$0xff]  }
 0x5d9   : > { %v864_v47 = vsub.f32 %v860_v45, %v862_v44  ;;  %v863_v50 = vmul.f32 %v859_v46, %v859_v46  ;;  %v867_v58 = vsub.f32 %v847_v28, %v859_v46 }
 0x5da   : > { %v857_v48 = vpop.xlane.xlu1 %856 }
 0x5db   : > { %v868_v49 = vadd.f32 1e-05, %v864_v47  ;;  %v861_v51 = vmul.f32 0.0078125, %v857_v48 }
 0x5dd   : > { %1962 = vrsqrt.f32 %v868_v49  ;;  %v865_v52 = vsub.f32 %v861_v51, %v863_v50 }
 0x5df   : > { %v869_v53 = vadd.f32 1e-05, %v865_v52 }
 0x5e1   : > { %1964 = vrsqrt.f32 %v869_v53 }
 0x5ea   : > { %v1963_v55 = vpop.eup %1962 }
 0x5eb   : > { %v872_v56 = vmul.f32 %v1963_v55, %v866_v54 }
 0x5ed   : > { %v879_v61 = vmul.f32 %v1567_v57, %v872_v56 }
 0x5ee   : > { %v1965_v59 = vpop.eup %1964 }
 0x5ef   : > { %v873_v60 = vmul.f32 %v1965_v59, %v867_v58  ;;  %v886_v1 = vadd.f32 %v1568_v62, %v879_v61 }
 0x5f1   : > { %v880_v63 = vmul.f32 %v1567_v57, %v873_v60  ;;  %v1579_v60 = vld [vmem:[#allocation11 + $0x6] ss:$0 sm:$0xff] }
 0x5f3   : > { %v887_v2 = vadd.f32 %v1568_v62, %v880_v63 }
 0x5f5   : > { %v888_v3 = vpack.c.bf16 %v887_v2, %v886_v1  ;;  %v1580_v2 = vld [vmem:[#allocation11 + $0x9] ss:$0 sm:$0xff] }
 0x5f7   : > { %1773 = vmatmul.mubr.bf16.vlgmr.msra.gmra.mxu0 %v888_v3 }
 0x5f8   : > { %1798 = vmatprep.mubr.msk.bf16.mxu0 %vm2223_vm0, %v2222_v0  ;;  %1783 = vmatpush3.bf16.msra.mxu0 %v1950_v37 }
 0x5f9   : > { %1784 = vmatprep.subr.bf16.mxu0 %v2222_v0 }
 0x6b7   : > { %v988_v4 = vpop.f32.mrf.mxu0 }
 0x6b9   : > { %v1774_v5 = vpop.f32.mrf.mxu0 }
 0x6bb   : > { %v991_v6 = vpop.f32.mrf.mxu0 }
 0x6bc   : > { %v995_v8 = vpack.c.bf16 %v991_v6, %v988_v4 }
 0x6bd   : > { %v1775_v9 = vpop.f32.mrf.mxu0 }
 0x6be   : > { %1777 = vmatpush3.bf16.msra.mxu1 %v995_v8 }
 0x6bf   : > { %1653 = vmatprep.subr.bf16.mxu1 %v1934_v7 }
 0x6c1   : > { %1779 = vmatmul.mubr.msk.bf16.vlgmr.msra.gmra.mxu1 %vm605_vm1, %v2513_v31  ;;  %v1946_v31 = vld [vmem:[#allocation10 + $0x48] sm:$0xff]  }
 0x6c2   : > { %1654 = vmatpush3.bf16.msra.mxu1 %v1935_v10  ;;  %1314 = vmatprep.mubr.bf16.mxu1 %v888_v3 }
 0x6c3   : > { %1655 = vmatprep.subr.bf16.mxu1 %v1936_v11 }
 0x6c6   : > { %1656 = vmatpush3.bf16.msra.mxu1 %v1937_v12 }
 0x6c7   : > { %1657 = vmatprep.subr.bf16.mxu1 %v1938_v13  ;;  %v1581_v13 = vld [vmem:[#allocation11 + $0xa] ss:$0 sm:$0xff] }
 0x6ca   : > { %1658 = vmatpush3.bf16.msra.mxu1 %v1939_v15 }
 0x6cb   : > { %1659 = vmatprep.subr.bf16.mxu1 %v1940_v16 }
 0x6ce   : > { %1660 = vmatpush3.bf16.msra.mxu1 %v1941_v17 }
 0x6cf   : > { %1661 = vmatprep.subr.bf16.mxu1 %v1942_v18 }
 0x6d2   : > { %1662 = vmatpush3.bf16.msra.mxu1 %v1943_v19 }
 0x6d3   : > { %1663 = vmatprep.subr.bf16.mxu1 %v1944_v20 }
 0x6d6   : > { %1664 = vmatpush3.bf16.msra.mxu1 %v1945_v21 }
 0x6d7   : > { %1665 = vmatprep.subr.bf16.mxu1 %v1946_v31 }
 0x6da   : > { %1666 = vmatpush3.bf16.msra.mxu1 %v1947_v22 }
 0x6db   : > { %1667 = vmatprep.subr.bf16.mxu1 %v1948_v23 }
 0x6de   : > { %1668 = vmatpush3.bf16.msra.mxu1 %v1949_v24 }
 0x6e1   : > { %1315 = vmatmul.mubr.bf16.vlgmr.msra.gmra.mxu1 %v2528_v14  ;;  %v1951_v14 = vld [vmem:[#allocation10 + $0xb0] sm:$0xff]  }
 0x6e2   : > { %1785 = vmatpush3.bf16.msra.mxu0 %v1951_v14 }
 0x6e3   : > { %1786 = vmatprep.subr.bf16.mxu0 %v2222_v0 }
 0x6e6   : > { %1787 = vmatpush3.bf16.msra.mxu0 %v1952_v38 }
 0x6e7   : > { %1788 = vmatprep.subr.bf16.mxu0 %v2222_v0 }
 0x6ea   : > { %1789 = vmatpush3.bf16.msra.mxu0 %v1953_v39 }
 0x6eb   : > { %1790 = vmatprep.subr.bf16.mxu0 %v2222_v0 }
 0x6ee   : > { %1791 = vmatpush3.bf16.msra.mxu0 %v1954_v40 }
 0x6ef   : > { %1792 = vmatprep.subr.bf16.mxu0 %v2222_v0 }
 0x6f2   : > { %1793 = vmatpush3.bf16.msra.mxu0 %v1955_v41 }
 0x6f3   : > { %1794 = vmatprep.subr.bf16.mxu0 %v2222_v0 }
 0x6f6   : > { %1795 = vmatpush3.bf16.msra.mxu0 %v1956_v42 }
 0x6f7   : > { %1796 = vmatprep.subr.bf16.mxu0 %v2222_v0 }
 0x6fa   : > { %1797 = vmatpush3.bf16.msra.mxu0 %v1957_v43 }
 0x781   : > { %v1035_v26 = vpop.f32.mrf.mxu1 }
 0x782   : > { %v1036_v27 = vadd.f32 %v1577_v25, %v1035_v26 }
 0x783   : > { %v1780_v28 = vpop.f32.mrf.mxu1 }
 0x784   : > { %v1042_v29 = vmax.f32 %v1036_v27, 0.0 }
 0x785   : > { %v1038_v30 = vpop.f32.mrf.mxu1 }
 0x786   : > { %v1039_v32 = vadd.f32 %v1577_v25, %v1038_v30  ;;  %1044 = vadd.xlane.f32.xlu0 %v1042_v29  ;;  %v1048_v35 = vmul.f32 %v1042_v29, %v1042_v29 }
 0x787   : > { %v1781_v33 = vpop.f32.mrf.mxu1 }
 0x788   : > { %v1043_v34 = vmax.f32 %v1039_v32, 0.0 }
 0x78a   : > { %1050 = vadd.xlane.f32.xlu0 %v1048_v35  ;;  %1046 = vadd.xlane.f32.xlu1 %v1043_v34  ;;  %v1049_v36 = vmul.f32 %v1043_v34, %v1043_v34 }
 0x78e   : > { %1052 = vadd.xlane.f32.xlu1 %v1049_v36 }
 0x7a1   : > { %v1669_v7 = vpop.f32.mrf.mxu1 }
 0x7a3   : > { %v1670_v8 = vpop.f32.mrf.mxu1 }
 0x7a4   : > { %v1671_v11 = vadd.f32 %v1670_v8, %v1669_v7 }
 0x7a5   : > { %v1672_v9 = vpop.f32.mrf.mxu1 }
 0x7a6   : > { %v1317_v17 = vadd.f32 %v1671_v11, %v1581_v13 }
 0x7a7   : > { %v1673_v10 = vpop.f32.mrf.mxu1 }
 0x7a8   : > { %v1674_v12 = vadd.f32 %v1673_v10, %v1672_v9 }
 0x7aa   : > { %v1320_v18 = vadd.f32 %v1674_v12, %v1581_v13 }
 0x80f   : > { %v1045_v44 = vpop.xlane.xlu0 %1044 }
 0x810   : > { %v1054_v45 = vmul.f32 0.0078125, %v1045_v44 }
 0x812   : > { %v1058_v48 = vmul.f32 %v1054_v45, %v1054_v45  ;;  %v1062_v58 = vsub.f32 %v1042_v29, %v1054_v45 }
 0x813   : > { %v1051_v46 = vpop.xlane.xlu0 %1050  ;;  %v1047_v47 = vpop.xlane.xlu1 %1046 }
 0x814   : > { %v1056_v49 = vmul.f32 0.0078125, %v1051_v46  ;;  %v1055_v50 = vmul.f32 0.0078125, %v1047_v47 }
 0x816   : > { %v1060_v51 = vsub.f32 %v1056_v49, %v1058_v48  ;;  %v1059_v54 = vmul.f32 %v1055_v50, %v1055_v50  ;;  %v1063_v61 = vsub.f32 %v1043_v34, %v1055_v50 }
 0x817   : > { %v1053_v52 = vpop.xlane.xlu1 %1052 }
 0x818   : > { %v1064_v53 = vadd.f32 1e-05, %v1060_v51  ;;  %v1057_v55 = vmul.f32 0.0078125, %v1053_v52 }
 0x81a   : > { %1966 = vrsqrt.f32 %v1064_v53  ;;  %v1061_v56 = vsub.f32 %v1057_v55, %v1059_v54 }
 0x81c   : > { %v1065_v57 = vadd.f32 1e-05, %v1061_v56 }
 0x81e   : > { %1968 = vrsqrt.f32 %v1065_v57 }
 0x827   : > { %v1967_v59 = vpop.eup %1966 }
 0x828   : > { %v1068_v0 = vmul.f32 %v1967_v59, %v1062_v58 }
 0x82a   : > { %v1075_v1 = vmul.f32 %v1579_v60, %v1068_v0 }
 0x82b   : > { %v1969_v62 = vpop.eup %1968 }
 0x82c   : > { %v1069_v63 = vmul.f32 %v1969_v62, %v1063_v61  ;;  %v1082_v4 = vadd.f32 %v1580_v2, %v1075_v1 }
 0x82e   : > { %v1076_v3 = vmul.f32 %v1579_v60, %v1069_v63 }
 0x830   : > { %v1083_v5 = vadd.f32 %v1580_v2, %v1076_v3 }
 0x832   : > { %v1084_v6 = vpack.c.bf16 %v1083_v5, %v1082_v4 }
 0x834   : > { %1799 = vmatmul.mubr.bf16.vlgmr.msra.gmra.mxu0 %v1084_v6 }
 0x8f4   : > { %v1357_v15 = vpop.f32.mrf.mxu0 }
 0x8f5   : > { %v1358_v20 = vadd.f32 %v1357_v15, %v1317_v17 }
 0x8f6   : > { %v1800_v16 = vpop.f32.mrf.mxu0 }
 0x8f8   : > { %v1360_v19 = vpop.f32.mrf.mxu0 }
 0x8f9   : > { %v1361_v21 = vadd.f32 %v1360_v19, %v1320_v18 }
 0x8fa   : > { %v1801_v31 = vpop.f32.mrf.mxu0 }
 0x8fb   : > { %v1364_v22 = vadd.f32 %v1361_v21, %v1358_v20 }
 0x8fd   : > { %v1365_v23 = vrot.slane %v1364_v22, 4 }
 0x8ff   : > { %v1366_v24 = vadd.f32 %v1365_v23, %v1364_v22 }
 0x901   : > { %v1367_v25 = vrot.slane %v1366_v24, 2 }
 0x903   : > { %v1368_v26 = vadd.f32 %v1367_v25, %v1366_v24 }
 0x905   : > { %v1369_v27 = vrot.slane %v1368_v26, 1 }
 0x907   : > { %v1370_v28 = vadd.f32 %v1369_v27, %v1368_v26 }
 0x909   : > { %v1372_v29 = vmul.f32 0.0625, %v1370_v28 }
 0x90b   : > { %1373 = vst [vmem:[%s366_s11] sm:$0x1] %v1372_v29 }
 0x90c   : > { %2143 = shalt.err (!%p2140_p0)
}
 0x90d   : > { %s2144_s19 = scalar_lea.hbm %s1385_s7, 16  ;;  %s2148_s8 = scalar_lea.hbm %s2599_s6, 64 }
 0x90e   : > { %p2145_p8 = scmp.ne.s32.totalorder %s1385_s7, %s2144_s19  ;;  %p2149_p7 = scmp.lt.s32.totalorder %s1385_s7, %s2599_s6 }
 0x90f   : > { %p2150_p1 = scmp.lt.s32.totalorder %s2148_s8, %s2144_s19 }
 0x910   : > { %p2146_p2 = pnand %p2145_p8, %p2628_p10 }
 0x911   : > { %p2151_p9 = por %p2150_p1, %p2149_p7 }
 0x912   : > { %p2147_p12 = pneg %p2146_p2 }
 0x914   : > { %p2152_p13 = pnand %p2151_p9, %p2147_p12 }
 0x916   : > { %2155 = shalt.err (!%p2152_p13)
}
 0x917   : > { %1822 = dma.vmem_to_hbm [thread:$0]  (%p2628_p10), %s1388_s2, 16, %s1385_s7, %s1375_s10  }
 0x918 PF: > { %p1857_p3 = scmp.ge.s32.totalorder %s2210_s24, 2  ;;  %s1399_s29 = sand.u32 1, %s2198_s21  }
 0x919   : > { %p2629_p11 = scmp.ne.s32.totalorder %s2611_s28, 0  ;;  %s1400_s17 = scalar_lea.sflag [#allocation4], %s1399_s29 }
 0x91b   : > { %p1845_p4 = pnand %p1857_p3, %p2629_p11 }
 0x91d   : > { %p1846_p6 = pneg %p1845_p4 }
 0x91f   : > { %2193 = dma.done.wait (%p1846_p6), %s1400_s17, 16  }
 0x920   : > { %2195 = vsyncadd (%p1846_p6), %s1400_s17, 4294967280  ;;  %p24_p5 = scmp.ge.s32.totalorder %s2356_s18, 6   ;;  %s2630_s21 = smov %s2202_s22 }
 0x921   : > { %s2631_s22 = smov %s2206_s23  ;;  %s2632_s23 = smov %s2365_s26 }
 0x922   : > { %s2633_s24 = smov %s2356_s18  ;;  %26 = sbr.rel (!%p24_p5) target bundleno = 13 (0xd), region = 120 }
 0x927   :  { %1404 = vsyncpa [#allocation3], 1 }
 0x928   :  { %1406 = vsyncpa [#allocation3 + $0x1], 1 }
 0x929   :  { %1407 = vsyncpa [#allocation6], 1 }
 0x92a   :  { %1409 = vsyncpa [#allocation6 + $0x1], 1 }
 0x92b   :  { %1410 = vsyncpa [#allocation9], 1 }
 0x92c   :  { %1411 = vsyncpa [#allocation12], 1 }
 0x92d   :  { %1412 = vsyncpa [#allocation4], 1 }
 0x92e   :  { %1414 = vsyncpa [#allocation4 + $0x1], 1 }

</bundles_post_ra>
